<compile_context>
chip_gen: v7x
topology: tpu7x:2x2x1
jax: 0.10.0
libtpu: 0.0.40
codegen_flags: <defaults>
</compile_context>

<pallas_src>
import jax
import jax.numpy as jnp
from jax.experimental import pallas as pl
from jax.experimental.pallas import tpu as pltpu


def _round_up(x, m):
    return (x + m - 1) // m * m


def _fused_geneset_attention_kernel(src_ref, tgt_ref, w1_ref, b1_ref,
                                    w2_ref, b2_ref, mask_ref, out_ref, cat_ref):
    """One gene set per grid step (grid=(G,)); all operands (8,128)-padded.

    src_ref  : [B_pad, S_pad]       shared source features (resident across grid)
    tgt_ref  : [1, B_pad, T_pad]    zero-padded target slice for gene set g
    w1_ref   : [1, S_pad, D_pad]    source_transform weight (zero-padded)
    b1_ref   : [1, 1, D_pad]        source_transform bias
    w2_ref   : [1, C_pad, T_pad]    attention weight acting on [target | se]
    b2_ref   : [1, 1, T_pad]        attention bias
    mask_ref : [1, 1, T_pad]        1.0 on valid target lanes, 0.0 on padding
    out_ref  : [B_pad, T_pad]       column block g of the [B_pad, G*T_pad] slab
    cat_ref  : [B_pad, C_pad]       VMEM scratch holding the fused concat operand
    """
    src = src_ref[...]
    tgt = tgt_ref[0]
    t_pad = tgt.shape[-1]

    # source_transform_layer: Linear + ReLU (NormLinear with norm='none')
    se = jnp.dot(src, w1_ref[0], preferred_element_type=jnp.float32) + b1_ref[0]
    se = jnp.maximum(se, 0.0)

    # Single fused attention matmul over K = T_pad + D_pad.
    # Concat order is [target, source_embedding], matching torch.cat in the module.
    cat_ref[:, :t_pad] = tgt
    cat_ref[:, t_pad:] = se
    logits = (jnp.dot(cat_ref[...], w2_ref[0], preferred_element_type=jnp.float32)
              + b2_ref[0])

    # tanh -> masked softmax over the valid target lanes only
    a = jnp.tanh(logits)
    a = jnp.where(mask_ref[0] > 0.0, a, -1e30)
    a = a - jnp.max(a, axis=-1, keepdims=True)
    e = jnp.exp(a)
    attn = e * pl.reciprocal(jnp.sum(e, axis=-1, keepdims=True), approx=True)

    # attended_target = attention * target  (dropout is identity in eval mode;
    # padded lanes give 0 because the padded target is 0)
    out_ref[...] = (attn * tgt).astype(out_ref.dtype)


def init_geneset_params(key, source_len, geneset_lengths, source_attn_ratio=4):
    """Deterministic init mimicking nn.Linear default (U[-1/sqrt(fan_in), ..])."""
    params = []
    for gs_num in geneset_lengths:
        d = int(gs_num / source_attn_ratio) + 1          # source_transform_dim
        cin = gs_num + d                                  # concat_input_dim
        key, k1, k2, k3, k4 = jax.random.split(key, 5)
        lim1 = 1.0 / jnp.sqrt(float(source_len))
        lim2 = 1.0 / jnp.sqrt(float(cin))
        params.append(dict(
            w1=jax.random.uniform(k1, (source_len, d), jnp.float32, -lim1, lim1),
            b1=jax.random.uniform(k2, (1, d), jnp.float32, -lim1, lim1),
            w2=jax.random.uniform(k3, (cin, gs_num), jnp.float32, -lim2, lim2),
            b2=jax.random.uniform(k4, (1, gs_num), jnp.float32, -lim2, lim2),
        ))
    return params


def pack_geneset_params(params, geneset_lengths, source_len):
    """Stack + zero-pad all per-gene-set weights into (8,128)-aligned slabs."""
    G = len(geneset_lengths)
    d_dims = [p["w1"].shape[1] for p in params]
    S_pad = _round_up(source_len, 128)
    T_pad = _round_up(max(geneset_lengths), 128)
    D_pad = _round_up(max(d_dims), 128)
    C_pad = T_pad + D_pad

    w1_s = jnp.zeros((G, S_pad, D_pad), jnp.float32)
    b1_s = jnp.zeros((G, 1, D_pad), jnp.float32)
    w2_s = jnp.zeros((G, C_pad, T_pad), jnp.float32)
    b2_s = jnp.zeros((G, 1, T_pad), jnp.float32)
    mask = jnp.zeros((G, 1, T_pad), jnp.float32)

    for g, (p, t, d) in enumerate(zip(params, geneset_lengths, d_dims)):
        w1_s = w1_s.at[g, :source_len, :d].set(p["w1"])
        b1_s = b1_s.at[g, 0, :d].set(p["b1"].reshape(-1))
        # first t rows of W2 act on target, remaining d rows on source_embedding
        w2_s = w2_s.at[g, :t, :t].set(p["w2"][:t, :])
        w2_s = w2_s.at[g, T_pad:T_pad + d, :t].set(p["w2"][t:, :])
        b2_s = b2_s.at[g, 0, :t].set(p["b2"].reshape(-1))
        mask = mask.at[g, 0, :t].set(1.0)

    dims = dict(S_pad=S_pad, T_pad=T_pad, D_pad=D_pad, C_pad=C_pad)
    return dict(w1=w1_s, b1=b1_s, w2=w2_s, b2=b2_s, mask=mask), dims


def graph_geneset_attention_forward(target_feat, t_source, geneset_lengths,
                                    packed, dims):
    """Pad inputs, run the single fused kernel, gather valid columns."""
    B, S = t_source.shape
    G = len(geneset_lengths)
    S_pad, T_pad, D_pad, C_pad = (dims["S_pad"], dims["T_pad"],
                                  dims["D_pad"], dims["C_pad"])
    B_pad = _round_up(max(B, 8), 8)

    target_feat = target_feat.reshape(B, -1)

    # wrapper-side zero padding to aligned tiles
    src_pad = jnp.zeros((B_pad, S_pad), jnp.float32).at[:B, :S].set(t_source)
    tgt_pad = jnp.zeros((G, B_pad, T_pad), jnp.float32)
    c = 0
    for g, n in enumerate(geneset_lengths):
        tgt_pad = tgt_pad.at[g, :B, :n].set(target_feat[:, c:c + n])
        c += n

    slab = pl.pallas_call(
        _fused_geneset_attention_kernel,
        out_shape=jax.ShapeDtypeStruct((B_pad, G * T_pad), jnp.float32),
        grid=(G,),
        in_specs=[
            pl.BlockSpec((B_pad, S_pad), lambda g: (0, 0)),        # src (resident)
            pl.BlockSpec((1, B_pad, T_pad), lambda g: (g, 0, 0)),  # target slice
            pl.BlockSpec((1, S_pad, D_pad), lambda g: (g, 0, 0)),  # w1
            pl.BlockSpec((1, 1, D_pad), lambda g: (g, 0, 0)),      # b1
            pl.BlockSpec((1, C_pad, T_pad), lambda g: (g, 0, 0)),  # w2
            pl.BlockSpec((1, 1, T_pad), lambda g: (g, 0, 0)),      # b2
            pl.BlockSpec((1, 1, T_pad), lambda g: (g, 0, 0)),      # valid-lane mask
        ],
        out_specs=pl.BlockSpec((B_pad, T_pad), lambda g: (0, g)),
        scratch_shapes=[pltpu.VMEM((B_pad, C_pad), jnp.float32)],
        compiler_params=pltpu.CompilerParams(
            dimension_semantics=("parallel",)),
    )(src_pad, tgt_pad, packed["w1"], packed["b1"],
      packed["w2"], packed["b2"], packed["mask"])

    # gather the valid (unpadded) columns into the final [B, total_genes] output
    cols = []
    for g, n in enumerate(geneset_lengths):
        cols.extend(range(g * T_pad, g * T_pad + n))
    col_idx = jnp.asarray(cols, dtype=jnp.int32)
    return slab[:B][:, col_idx]


def _reference(target_feat, t_source, geneset_lengths, params):
    """Pure-JAX reference for correctness check."""
    B = t_source.shape[0]
    target_feat = target_feat.reshape(B, -1)
    outs, c = [], 0
    for n, p in zip(geneset_lengths, params):
        tgt = target_feat[:, c:c + n]
        c += n
        se = jax.nn.relu(t_source @ p["w1"] + p["b1"])
        concat = jnp.concatenate([tgt, se], axis=-1)
        attn = jax.nn.softmax(jnp.tanh(concat @ p["w2"] + p["b2"]), axis=-1)
        outs.append(attn * tgt)
    return jnp.concatenate(outs, axis=-1)


if __name__ == "__main__":
    key = jax.random.PRNGKey(0)

    # Small synthetic problem: 3 gene sets, batch=4, source_len=32
    batch = 4
    source_len = 32
    geneset_lengths = [24, 16, 12]        # GeneSet_Dict sizes
    total_genes = sum(geneset_lengths)

    key, ks, kt, kp = jax.random.split(key, 4)
    t_source = jax.random.normal(ks, (batch, source_len), jnp.float32)
    target_feat = jax.random.normal(kt, (batch, total_genes), jnp.float32)
    params = init_geneset_params(kp, source_len, geneset_lengths,
                                 source_attn_ratio=4)
    packed, dims = pack_geneset_params(params, geneset_lengths, source_len)

    out = graph_geneset_attention_forward(target_feat, t_source,
                                          geneset_lengths, packed, dims)
    out = jax.block_until_ready(out)

    ref = _reference(target_feat, t_source, geneset_lengths, params)
    assert out.shape == (batch, total_genes), out.shape
    # tolerance accounts for pl.reciprocal(approx=True) + EUP tanh/exp
    err = float(jnp.max(jnp.abs(out - ref)))
    assert jnp.allclose(out, ref, atol=2e-3, rtol=2e-3), err

    print("KERNEL_OK")
</pallas_src>

<mosaic_0001>
module attributes {stable_mosaic.version = 11 : i64} {
  func.func @_fused_geneset_attention_kernel(%arg0: i32, %arg1: memref<8x128xf32, #tpu.memory_space<vmem>>, %arg2: memref<1x8x128xf32, #tpu.memory_space<vmem>>, %arg3: memref<1x128x128xf32, #tpu.memory_space<vmem>>, %arg4: memref<1x1x128xf32, #tpu.memory_space<vmem>>, %arg5: memref<1x256x128xf32, #tpu.memory_space<vmem>>, %arg6: memref<1x1x128xf32, #tpu.memory_space<vmem>>, %arg7: memref<1x1x128xf32, #tpu.memory_space<vmem>>, %arg8: memref<8x128xf32, #tpu.memory_space<vmem>>, %arg9: memref<8x256xf32, #tpu.memory_space<vmem>>) attributes {dimension_semantics = [#tpu.dimension_semantics<parallel>], iteration_bounds = array<i64: 3>, scalar_prefetch = 0 : i64, scratch_operands = 1 : i64, tpu.core_type = #tpu.core_type<tc>, window_params = [{pipeline_mode = #tpu.pipeline_mode<synchronous>, transform_indices = @transform_0, window_bounds = array<i64: 8, 128>}, {transform_indices = @transform_1, window_bounds = array<i64: 1, 8, 128>}, {transform_indices = @transform_2, window_bounds = array<i64: 1, 128, 128>}, {transform_indices = @transform_3, window_bounds = array<i64: 1, 1, 128>}, {transform_indices = @transform_4, window_bounds = array<i64: 1, 256, 128>}, {transform_indices = @transform_5, window_bounds = array<i64: 1, 1, 128>}, {transform_indices = @transform_6, window_bounds = array<i64: 1, 1, 128>}, {transform_indices = @transform_7, window_bounds = array<i64: 8, 128>}]} {
    %c0 = arith.constant 0 : index
    %c0_0 = arith.constant 0 : index
    %0 = vector.load %arg1[%c0, %c0_0] : memref<8x128xf32, #tpu.memory_space<vmem>>, vector<8x128xf32>
    %c0_1 = arith.constant 0 : index
    %c0_2 = arith.constant 0 : index
    %c0_3 = arith.constant 0 : index
    %1 = vector.load %arg2[%c0_1, %c0_2, %c0_3] : memref<1x8x128xf32, #tpu.memory_space<vmem>>, vector<1x8x128xf32>
    %2 = vector.shape_cast %1 : vector<1x8x128xf32> to vector<8x128xf32>
    %c0_4 = arith.constant 0 : index
    %c0_5 = arith.constant 0 : index
    %c0_6 = arith.constant 0 : index
    %3 = vector.load %arg3[%c0_4, %c0_5, %c0_6] : memref<1x128x128xf32, #tpu.memory_space<vmem>>, vector<1x128x128xf32>
    %4 = vector.shape_cast %3 : vector<1x128x128xf32> to vector<128x128xf32>
    %cst = arith.constant dense<0.000000e+00> : vector<8x128xf32>
    %5 = tpu.matmul %0, %4, %cst {dimension_numbers = #tpu.dot_dimension_numbers<[1], [0], [0], [1], [0, 0, 1, 1], [], []>} : vector<8x128xf32>, vector<128x128xf32>, vector<8x128xf32> -> vector<8x128xf32>
    %c0_7 = arith.constant 0 : index
    %c0_8 = arith.constant 0 : index
    %c0_9 = arith.constant 0 : index
    %6 = vector.load %arg4[%c0_7, %c0_8, %c0_9] : memref<1x1x128xf32, #tpu.memory_space<vmem>>, vector<1x1x128xf32>
    %7 = vector.shape_cast %6 : vector<1x1x128xf32> to vector<1x128xf32>
    %8 = vector.broadcast %7 : vector<1x128xf32> to vector<8x128xf32>
    %9 = arith.addf %5, %8 : vector<8x128xf32>
    %cst_10 = arith.constant 0.000000e+00 : f32
    %10 = vector.broadcast %cst_10 : f32 to vector<8x128xf32>
    %11 = arith.maximumf %9, %10 : vector<8x128xf32>
    %c0_11 = arith.constant 0 : index
    %c0_12 = arith.constant 0 : index
    %12 = vector.load %arg9[%c0_11, %c0_12] : memref<8x256xf32, #tpu.memory_space<vmem>>, vector<8x128xf32>
    tpu.vector_store %arg9[%c0_11, %c0_12], %2 {strides = array<i32>} : memref<8x256xf32, #tpu.memory_space<vmem>>, vector<8x128xf32>,
    %c0_13 = arith.constant 0 : index
    %c128 = arith.constant 128 : index
    %13 = vector.load %arg9[%c0_13, %c128] : memref<8x256xf32, #tpu.memory_space<vmem>>, vector<8x128xf32>
    tpu.vector_store %arg9[%c0_13, %c128], %11 {strides = array<i32>} : memref<8x256xf32, #tpu.memory_space<vmem>>, vector<8x128xf32>,
    %c0_14 = arith.constant 0 : index
    %c0_15 = arith.constant 0 : index
    %14 = vector.load %arg9[%c0_14, %c0_15] : memref<8x256xf32, #tpu.memory_space<vmem>>, vector<8x256xf32>
    %c0_16 = arith.constant 0 : index
    %c0_17 = arith.constant 0 : index
    %c0_18 = arith.constant 0 : index
    %15 = vector.load %arg5[%c0_16, %c0_17, %c0_18] : memref<1x256x128xf32, #tpu.memory_space<vmem>>, vector<1x256x128xf32>
    %16 = vector.shape_cast %15 : vector<1x256x128xf32> to vector<256x128xf32>
    %cst_19 = arith.constant dense<0.000000e+00> : vector<8x128xf32>
    %17 = tpu.matmul %14, %16, %cst_19 {dimension_numbers = #tpu.dot_dimension_numbers<[1], [0], [0], [1], [0, 0, 1, 1], [], []>} : vector<8x256xf32>, vector<256x128xf32>, vector<8x128xf32> -> vector<8x128xf32>
    %c0_20 = arith.constant 0 : index
    %c0_21 = arith.constant 0 : index
    %c0_22 = arith.constant 0 : index
    %18 = vector.load %arg6[%c0_20, %c0_21, %c0_22] : memref<1x1x128xf32, #tpu.memory_space<vmem>>, vector<1x1x128xf32>
    %19 = vector.shape_cast %18 : vector<1x1x128xf32> to vector<1x128xf32>
    %20 = vector.broadcast %19 : vector<1x128xf32> to vector<8x128xf32>
    %21 = arith.addf %17, %20 : vector<8x128xf32>
    %22 = math.tanh %21 : vector<8x128xf32>
    %c0_23 = arith.constant 0 : index
    %c0_24 = arith.constant 0 : index
    %c0_25 = arith.constant 0 : index
    %23 = vector.load %arg7[%c0_23, %c0_24, %c0_25] : memref<1x1x128xf32, #tpu.memory_space<vmem>>, vector<1x1x128xf32>
    %24 = vector.shape_cast %23 : vector<1x1x128xf32> to vector<1x128xf32>
    %cst_26 = arith.constant 0.000000e+00 : f32
    %25 = vector.broadcast %cst_26 : f32 to vector<1x128xf32>
    %26 = arith.cmpf ogt, %24, %25 : vector<1x128xf32>
    %cst_27 = arith.constant -1.000000e+30 : f32
    %27 = vector.shape_cast %26 : vector<1x128xi1> to vector<1x128xi1>
    %28 = vector.broadcast %27 : vector<1x128xi1> to vector<8x128xi1>
    %29 = vector.broadcast %cst_27 : f32 to vector<8x128xf32>
    %30 = arith.select %28, %22, %29 : vector<8x128xi1>, vector<8x128xf32>
    %cst_28 = arith.constant dense<0xFF800000> : vector<8xf32>
    %31 = vector.multi_reduction <maximumf>, %30, %cst_28 [1] : vector<8x128xf32> to vector<8xf32>
    %32 = vector.shape_cast %31 : vector<8xf32> to vector<8x1xf32>
    %33 = vector.broadcast %32 : vector<8x1xf32> to vector<8x128xf32>
    %34 = arith.subf %30, %33 : vector<8x128xf32>
    %35 = math.exp %34 : vector<8x128xf32>
    %cst_29 = arith.constant dense<0.000000e+00> : vector<8xf32>
    %36 = vector.multi_reduction <add>, %35, %cst_29 [1] : vector<8x128xf32> to vector<8xf32>
    %37 = vector.shape_cast %36 : vector<8xf32> to vector<8x1xf32>
    %38 = tpu.reciprocal %37 {approx = true} : vector<8x1xf32> -> vector<8x1xf32>
    %39 = vector.broadcast %38 : vector<8x1xf32> to vector<8x128xf32>
    %40 = arith.mulf %35, %39 : vector<8x128xf32>
    %41 = arith.mulf %40, %2 : vector<8x128xf32>
    %c0_30 = arith.constant 0 : index
    %c0_31 = arith.constant 0 : index
    %42 = vector.load %arg8[%c0_30, %c0_31] : memref<8x128xf32, #tpu.memory_space<vmem>>, vector<8x128xf32>
    tpu.vector_store %arg8[%c0_30, %c0_31], %41 {strides = array<i32>} : memref<8x128xf32, #tpu.memory_space<vmem>>, vector<8x128xf32>,
    return
  }
  func.func @transform_0(%arg0: i32) -> (i32, i32) {
    %c0_i32 = arith.constant 0 : i32
    %c0_i32_0 = arith.constant 0 : i32
    %c0_i32_1 = arith.constant 0 : i32
    return %c0_i32, %c0_i32_0 : i32, i32
  }
  func.func @transform_1(%arg0: i32) -> (i32, i32, i32) {
    %c0_i32 = arith.constant 0 : i32
    %c0_i32_0 = arith.constant 0 : i32
    %c0_i32_1 = arith.constant 0 : i32
    return %arg0, %c0_i32, %c0_i32_0 : i32, i32, i32
  }
  func.func @transform_2(%arg0: i32) -> (i32, i32, i32) {
    %c0_i32 = arith.constant 0 : i32
    %c0_i32_0 = arith.constant 0 : i32
    %c0_i32_1 = arith.constant 0 : i32
    return %arg0, %c0_i32, %c0_i32_0 : i32, i32, i32
  }
  func.func @transform_3(%arg0: i32) -> (i32, i32, i32) {
    %c0_i32 = arith.constant 0 : i32
    %c0_i32_0 = arith.constant 0 : i32
    %c0_i32_1 = arith.constant 0 : i32
    return %arg0, %c0_i32, %c0_i32_0 : i32, i32, i32
  }
  func.func @transform_4(%arg0: i32) -> (i32, i32, i32) {
    %c0_i32 = arith.constant 0 : i32
    %c0_i32_0 = arith.constant 0 : i32
    %c0_i32_1 = arith.constant 0 : i32
    return %arg0, %c0_i32, %c0_i32_0 : i32, i32, i32
  }
  func.func @transform_5(%arg0: i32) -> (i32, i32, i32) {
    %c0_i32 = arith.constant 0 : i32
    %c0_i32_0 = arith.constant 0 : i32
    %c0_i32_1 = arith.constant 0 : i32
    return %arg0, %c0_i32, %c0_i32_0 : i32, i32, i32
  }
  func.func @transform_6(%arg0: i32) -> (i32, i32, i32) {
    %c0_i32 = arith.constant 0 : i32
    %c0_i32_0 = arith.constant 0 : i32
    %c0_i32_1 = arith.constant 0 : i32
    return %arg0, %c0_i32, %c0_i32_0 : i32, i32, i32
  }
  func.func @transform_7(%arg0: i32) -> (i32, i32) {
    %c0_i32 = arith.constant 0 : i32
    %c0_i32_0 = arith.constant 0 : i32
    return %c0_i32, %arg0 : i32, i32
  }
}

</mosaic_0001>

<bundles_post_ra>
// kernel: tpu_custom_call.1
= control target key start
LH: loop header
LB: loop body
LE: loop exit
PB: predicated region body
PF: predicated region fallthrough
CT: control target
= control target key end

     0   :  { %s1672_s0 = inlined_call_operand.hbm [shape: f32[8,128], index: 0, kind: input, shape index: {}]   ;;  %s1673_s1 = inlined_call_operand.hbm [shape: f32[3,8,128], index: 1, kind: input, shape index: {}]   ;;  %s1674_s2 = inlined_call_operand.hbm [shape: f32[3,128,128], index: 2, kind: input, shape index: {}]   ;;  %s1675_s3 = inlined_call_operand.vmem [shape: f32[3,1,128], index: 3, kind: input, shape index: {}]   ;;  %s1676_s4 = inlined_call_operand.hbm [shape: f32[3,256,128], index: 4, kind: input, shape index: {}]   ;;  %s1677_s5 = inlined_call_operand.vmem [shape: f32[3,1,128], index: 5, kind: input, shape index: {}]   ;;  %s1678_s6 = inlined_call_operand.vmem [shape: f32[3,1,128], index: 6, kind: input, shape index: {}]   ;;  %s1679_s7 = inlined_call_operand.hbm [shape: f32[8,384], index: 7, kind: output, shape index: {}]  }
   0x1   :  { %1694 = sst [smem:[#allocation21_spill]] %s1673_s1 }
   0x2   :  { %12 = vsyncpa [#allocation4], 0 }
   0x3   :  { %13 = vsyncpa [#allocation7], 0 }
   0x4   :  { %15 = vsyncpa [#allocation7 + $0x1], 0 }
   0x5   :  { %16 = vsyncpa [#allocation10], 0 }
   0x6   :  { %18 = vsyncpa [#allocation10 + $0x1], 0 }
   0x7   :  { %19 = vsyncpa [#allocation5], 0 }
   0x8   :  { %21 = vsyncpa [#allocation5 + $0x1], 0  ;;  %s1315_s24 = smov 0   ;;  %s1317_s25 = smov 0  }
   0x9   :  { %s1319_s26 = smov 0   ;;  %s1321_s27 = smov 0  }
   0xa LB: > { %1695 = sst [smem:[#allocation16_spill]] %s1250_s24  ;;  %s1336_s28 = sadd.s32 1, %s1262_s27   ;;  %s1262_s27 = sphi %s1321_s27, %s1719_s27   ;;  %s1258_s26 = sphi %s1319_s26, %s1721_s26   ;;  %s1254_s25 = sphi %s1317_s25, %s1723_s25   ;;  %s1250_s24 = sphi %s1315_s24, %s1722_s24  }
   0xb   : > { %1696 = sst [smem:[#allocation17_spill]] %s1258_s26  ;;  %s55_s29 = sadd.s32 1, %s1258_s26 }
   0xc   : > { %1697 = sst [smem:[#allocation18_spill]] %s1336_s28  ;;  %s52_s30 = ssub.s32 %s1262_s27, %s1336_s28 }
   0xd   : > { %p1680_p0 = scmp.ne.s32.totalorder %s1258_s26, %s1254_s25  ;;  %p53_p1 = scmp.eq.s32.totalorder %s52_s30, 0 }
   0xe   : > { %p63_p2 = scmp.eq.s32.totalorder %s1262_s27, 0  ;;  %p1022_p3 = scmp.lt.s32.totalorder %s1262_s27, 3 }
   0xf   : > { %s1346_s8 = scalar_select %p53_p1, %s1258_s26, %s55_s29  }
  0x10   : > { %p64_p4 = por %p63_p2, %p1680_p0  ;;  %s259_s9 = sand.u32 1, %s1262_s27  }
  0x11   : > { %1698 = sst [smem:[#allocation19_spill]] %s1346_s8  ;;  %s1353_s10 = sand.u32 1, %s1258_s26  }
  0x12   : > { %s826_s11 = sshll.u32 %s1353_s10, 3  ;;  %s827_s12 = sshll.u32 %s1262_s27, 7 }
  0x13   : > { %s1699_s1 = sld [smem:[#allocation21_spill]]  ;;  %s263_s16 = scalar_lea.vmem [#allocation6], %s826_s11 }
  0x14   : > { %s270_s17 = sshll.u32 %s263_s16, 4  ;;  %p1362_p5 = pnand %p1022_p3, %p64_p4  ;;  %s1366_s17 = int_to_ptr.vmem [resolvable:$true] %s270_s17 }
  0x15   : > { %s828_s19 = sshll.u32 %s1353_s10, 7  ;;  %s1369_s20 = scalar_lea.sflag [#allocation7], %s259_s9 }
  0x16   : > { %s1700_s18 = scalar_select %p1362_p5, 1, 0 }
  0x17   : > { %p1375_p7 = pneg %p1362_p5 }
  0x19   : > { %s1360_s15 = scalar_lea.hbm %s1699_s1, %s827_s12  ;;  %s1075_s30 = scalar_lea.hbm %s1699_s1, 384 }
  0x1a   : > { %s1070_s21 = scalar_lea.hbm %s1360_s15, 128  ;;  %p1076_p10 = scmp.lt.u32.totalorder %s1360_s15, %s1699_s1 }
  0x1b   : > { %p1071_p6 = scmp.ne.s32.totalorder %s1360_s15, %s1070_s21  ;;  %p1077_p11 = scmp.lt.u32.totalorder %s1075_s30, %s1070_s21 }
  0x1c   : > { %s1701_s22 = scalar_select %p1375_p7, 1, 0 }
  0x1d   : > { %p1073_p8 = pnand %p1375_p7, %p1071_p6  ;;  %p1078_p12 = por %p1077_p11, %p1076_p10 }
  0x1e   : > { %p1079_p13 = scmp.lt.u32.totalorder %s1070_s21, %s1360_s15 }
  0x1f   : > { %p1074_p9 = pneg %p1073_p8 }
  0x20   : > { %p1080_p1 = por %p1079_p13, %p1078_p12 }
  0x22   : > { %p1081_p2 = pnand %p1080_p1, %p1074_p9 }
  0x24   : > { %1084 = shalt.err (!%p1081_p2)
}
  0x25   : > { %s1085_s9 = scalar_lea.vmem %s1366_s17, 128  ;;  %s1264_s13 = smov [#allocation6]  }
  0x26   : > { %p1086_p3 = scmp.ne.s32.totalorder %s1366_s17, %s1085_s9  ;;  %s1090_s14 = sshll.u32 %s1264_s13, 4  ;;  %s1091_s14 = int_to_ptr.vmem [resolvable:$false] %s1090_s14 }
  0x27   : > { %s1092_s16 = scalar_lea.vmem %s1091_s14, 256  ;;  %p1093_p8 = scmp.lt.s32.totalorder %s1366_s17, %s1091_s14 }
  0x28   : > { %p1088_p4 = pnand %p1086_p3, %p1375_p7  ;;  %p1094_p0 = scmp.lt.s32.totalorder %s1092_s16, %s1085_s9 }
  0x2a   : > { %p1089_p6 = pneg %p1088_p4  ;;  %p1095_p10 = por %p1094_p0, %p1093_p8 }
  0x2c   : > { %p1096_p11 = pnand %p1095_p10, %p1089_p6 }
  0x2e   : > { %1099 = shalt.err (!%p1096_p11)
}
  0x2f   : > { %1010 = dma.hbm_to_vmem [thread:$0]  (!%p1362_p5), %s1360_s15, 128, %s1366_s17, %s1369_s20  }
  0x30   : > { %s1400_s21 = sadd.s32 4294967295, %s1262_s27   ;;  %s822_s23 = sadd.s32 4294967294, %s1262_s27  }
  0x31   : > { %p68_p0 = scmp.ne.s32.totalorder %s1254_s25, %s1250_s24  ;;  %p1686_p9 = scmp.eq.s32.totalorder %s1400_s21, 0 }
  0x32   : > { %p222_p12 = scmp.eq.s32.totalorder %s1400_s21, 2  ;;  %p228_p13 = scmp.eq.s32.totalorder %s822_s23, 2 }
  0x33   : > { %p823_p1 = scmp.ge.s32.totalorder %s1262_s27, 1  ;;  %p1410_p2 = por %p1686_p9, %p68_p0 }
  0x34   : > { %p1703_p3 = scmp.ne.s32.totalorder %s1258_s26, %s1254_s25  ;;  %p1421_p6 = por %p228_p13, %p68_p0 }
  0x35   : > { %s1702_s29 = scalar_select %p1410_p2, 1, 0 }
  0x36   : > { %p1417_p4 = por %p222_p12, %p1703_p3  ;;  %p235_p8 = scmp.lt.s32.totalorder %s1262_s27, 4 }
  0x37   : > { %s1705_s17 = scalar_select %p1421_p6, 1, 0 }
  0x38   : > { %s1704_s15 = scalar_select %p1417_p4, 1, 0 }
  0x39   : > { %1706 = sst [smem:[#allocation20_spill]] %s1705_s17  ;;  %p1426_p10 = pnand %p823_p1, %p235_p8 }
  0x3a   : > { %s1265_s11 = smov [#allocation3]   ;;  %s846_s9 = sshll.u32 %s1262_s27, 11 }
  0x3b   : > { %s1707_s30 = scalar_select %p1426_p10, 1, 0 }
  0x3c   : > { %s248_s12 = sshll.u32 %s1265_s11, 4  ;;  %p1003_p11 = pneg %p1426_p10  ;;  %s249_s12 = int_to_ptr.vmem [resolvable:$true] %s248_s12 }
  0x3d   : > { %s1436_s16 = scalar_lea.hbm %s1674_s2, %s846_s9  ;;  %s281_s23 = scalar_lea.vmem [#allocation8], %s828_s19 }
  0x3e   : > { %s288_s1 = sshll.u32 %s281_s23, 4  ;;  %p1442_p0 = pnand %p1003_p11, %p1686_p9  ;;  %s1446_s1 = int_to_ptr.vmem [resolvable:$true] %s288_s1 }
  0x3f   : > { %s1100_s28 = scalar_lea.hbm %s1672_s0, 128 }
  0x40   : > { %p1101_p12 = scmp.ne.s32.totalorder %s1672_s0, %s1100_s28  ;;  %p1102_p13 = pneg %p1442_p0 }
  0x41   : > { %p1107_p8 = scmp.lt.u32.totalorder %s1100_s28, %s1672_s0 }
  0x42   : > { %p1103_p1 = pnand %p1102_p13, %p1101_p12 }
  0x44   : > { %p1104_p3 = pneg %p1103_p1 }
  0x46   : > { %p1109_p11 = pnand %p1107_p8, %p1104_p3 }
  0x48   : > { %1112 = shalt.err (!%p1109_p11)
}
  0x49   : > { %s1113_s13 = scalar_lea.vmem %s249_s12, 128  ;;  %p1121_p2 = scmp.lt.s32.totalorder %s249_s12, %s249_s12 }
  0x4a   : > { %p1114_p9 = scmp.ne.s32.totalorder %s249_s12, %s1113_s13  ;;  %p1122_p10 = scmp.lt.s32.totalorder %s1113_s13, %s1113_s13 }
  0x4c   : > { %p1116_p6 = pnand %p1114_p9, %p1102_p13  ;;  %p1123_p5 = por %p1122_p10, %p1121_p2 }
  0x4e   : > { %p1117_p4 = pneg %p1116_p6 }
  0x50   : > { %p1124_p7 = pnand %p1123_p5, %p1117_p4 }
  0x52   : > { %1127 = shalt.err (!%p1124_p7)
}
  0x53   : > { %1006 = dma.hbm_to_vmem [thread:$0]  (!%p1442_p0), %s1672_s0, 128, %s249_s12, [#allocation4]  }
  0x54   : > { %s1128_s28 = scalar_lea.hbm %s1436_s16, 2048  ;;  %p1709_p9 = scmp.ne.s32.totalorder %s1701_s22, 0 }
  0x55   : > { %p1129_p12 = scmp.ne.s32.totalorder %s1436_s16, %s1128_s28  ;;  %s1133_s23 = scalar_lea.hbm %s1674_s2, 6144 }
  0x56   : > { %p1134_p5 = scmp.lt.u32.totalorder %s1436_s16, %s1674_s2  ;;  %p1135_p7 = scmp.lt.u32.totalorder %s1133_s23, %s1128_s28 }
  0x57   : > { %p1131_p6 = pnand %p1129_p12, %p1709_p9  ;;  %p1137_p4 = scmp.lt.u32.totalorder %s1128_s28, %s1436_s16 }
  0x58   : > { %p1136_p2 = por %p1135_p7, %p1134_p5 }
  0x59   : > { %p1132_p13 = pneg %p1131_p6 }
  0x5a   : > { %p1138_p10 = por %p1137_p4, %p1136_p2 }
  0x5c   : > { %p1139_p1 = pnand %p1138_p10, %p1132_p13 }
  0x5e   : > { %1142 = shalt.err (!%p1139_p1)
}
  0x5f   : > { %s1143_s12 = scalar_lea.vmem %s1446_s1, 2048  ;;  %s1266_s19 = smov [#allocation8]  }
  0x60   : > { %p1144_p0 = scmp.ne.s32.totalorder %s1446_s1, %s1143_s12  ;;  %s1148_s9 = sshll.u32 %s1266_s19, 4  ;;  %s1149_s9 = int_to_ptr.vmem [resolvable:$false] %s1148_s9 }
  0x61   : > { %s1150_s13 = scalar_lea.vmem %s1149_s9, 4096  ;;  %p1151_p11 = scmp.lt.s32.totalorder %s1446_s1, %s1149_s9 }
  0x62   : > { %p1146_p3 = pnand %p1144_p0, %p1709_p9  ;;  %p1152_p12 = scmp.lt.s32.totalorder %s1150_s13, %s1143_s12 }
  0x64   : > { %p1147_p8 = pneg %p1146_p3  ;;  %p1153_p6 = por %p1152_p12, %p1151_p11 }
  0x66   : > { %p1154_p5 = pnand %p1153_p6, %p1147_p8 }
  0x68   : > { %1157 = shalt.err (!%p1154_p5)
}
  0x69   : > { %s1267_s24 = smov 128   ;;  %s1268_s26 = smov 8  }
  0x6a   : > { %p1710_p13 = scmp.ne.s32.totalorder %s1700_s18, 0  ;;  %s831_s28 = sshll.u32 %s1353_s10, 8 }
  0x6b   : > { %s847_s17 = sshll.u32 %s1262_s27, 12  ;;  %s308_s8 = scalar_lea.vmem [#allocation9], %s831_s28 }
  0x6c   : > { %1013 = dma.hbm_to_vmem [thread:$0]  (!%p1710_p13), %s1436_s16, 2048, %s1446_s1, %s1369_s20, %s1267_s24, %s1267_s24, %s1268_s26  }
  0x6d   : > { %s1494_s11 = scalar_lea.hbm %s1676_s4, %s847_s17  ;;  %s315_s12 = sshll.u32 %s308_s8, 4  ;;  %s1496_s12 = int_to_ptr.vmem [resolvable:$true] %s315_s12 }
  0x6e   : > { %s305_s19 = scalar_lea.sflag [#allocation10], %s1353_s10  ;;  %s1158_s9 = scalar_lea.hbm %s1494_s11, 4096 }
  0x6f   : > { %p1159_p7 = scmp.ne.s32.totalorder %s1494_s11, %s1158_s9  ;;  %s1163_s16 = scalar_lea.hbm %s1676_s4, 12288 }
  0x70   : > { %p1164_p10 = scmp.lt.u32.totalorder %s1494_s11, %s1676_s4  ;;  %p1165_p1 = scmp.lt.u32.totalorder %s1163_s16, %s1158_s9 }
  0x71   : > { %p1161_p2 = pnand %p1159_p7, %p1709_p9  ;;  %p1167_p3 = scmp.lt.u32.totalorder %s1158_s9, %s1494_s11 }
  0x72   : > { %p1166_p0 = por %p1165_p1, %p1164_p10 }
  0x73   : > { %p1162_p4 = pneg %p1161_p2 }
  0x74   : > { %p1168_p8 = por %p1167_p3, %p1166_p0 }
  0x76   : > { %p1169_p11 = pnand %p1168_p8, %p1162_p4 }
  0x78   : > { %1172 = shalt.err (!%p1169_p11)
}
  0x79   : > { %s1173_s28 = scalar_lea.vmem %s1496_s12, 4096  ;;  %s1269_s14 = smov [#allocation9]  }
  0x7a   : > { %p1174_p12 = scmp.ne.s32.totalorder %s1496_s12, %s1173_s28  ;;  %s1178_s23 = sshll.u32 %s1269_s14, 4  ;;  %s1179_s23 = int_to_ptr.vmem [resolvable:$false] %s1178_s23 }
  0x7b   : > { %s1180_s8 = scalar_lea.vmem %s1179_s23, 8192  ;;  %p1181_p7 = scmp.lt.s32.totalorder %s1496_s12, %s1179_s23 }
  0x7c   : > { %p1176_p6 = pnand %p1174_p12, %p1709_p9  ;;  %p1182_p2 = scmp.lt.s32.totalorder %s1180_s8, %s1173_s28 }
  0x7e   : > { %p1177_p5 = pneg %p1176_p6  ;;  %p1183_p10 = por %p1182_p2, %p1181_p7 }
  0x80   : > { %p1184_p1 = pnand %p1183_p10, %p1177_p5 }
  0x82   : > { %1187 = shalt.err (!%p1184_p1)
}
  0x83   : > { %1016 = dma.hbm_to_vmem [thread:$0]  (!%p1710_p13), %s1494_s11, 4096, %s1496_s12, %s305_s19, %s1267_s24, %s1267_s24, %s1268_s26  }
  0x84   : > { %p1711_p9 = scmp.ne.s32.totalorder %s1707_s30, 0 }
  0x85   : > { %p1712_p4 = scmp.eq.s32.totalorder (!%p1711_p9), %s1400_s21, 0 }
  0x86   : > { %339 = sbr.rel (%p1711_p9) target bundleno = 959 (0x3bf), region = 48 }
  0x8d   : > { %1233 = dma.done.wait (%p1712_p4), [#allocation4], 128   ;;  %p1713_p0 = pmov %p1712_p4 }
  0x8e   : > { %s345_s18 = sand.u32 1, %s1400_s21   ;;  %s1533_s22 = sand.u32 1, %s1254_s25  }
  0x8f   : > { %1235 = vsyncadd (%p1713_p0), [#allocation4], 4294967168  ;;  %s836_s10 = sshll.u32 %s1533_s22, 3  ;;  %s346_s9 = scalar_lea.sflag [#allocation7], %s345_s18 }
  0x90   : > { %s1538_s24 = scalar_lea.vmem [#allocation6], %s836_s10  ;;  %p1714_p13 = scmp.ne.s32.totalorder %s1702_s29, 0 }
  0x92   : > { %1237 = dma.done.wait (%p1714_p13), %s346_s9, 2176  }
  0x93   : > { %1239 = vsyncadd (%p1714_p13), %s346_s9, 4294965120  ;;  %s837_s30 = sshll.u32 %s1533_s22, 7  ;;  %s838_s26 = sshll.u32 %s1533_s22, 8 }
  0x94   : > { %s1546_s11 = scalar_lea.vmem [#allocation8], %s837_s30  ;;  %s364_s12 = scalar_lea.sflag [#allocation10], %s1533_s22 }
  0x95   : > { %s1549_s19 = scalar_lea.vmem [#allocation9], %s838_s26 }
  0x96   : > { %1241 = dma.done.wait (%p1714_p13), %s364_s12, 4096  }
  0x97   : > { %1243 = vsyncadd (%p1714_p13), %s364_s12, 4294963200  ;;  %v1270_v0 = vmov 0.0|0.0   ;;  %vm1271_vm0 = vmmov 0   ;;  %v1272_v1 = vmov 0.0   ;;  %v428_v2 = vld [vmem:[%s1546_s11] sm:$0xff]  ;;  %v429_v3 = vld [vmem:[%s1546_s11 + $0x8] sm:$0xff] }
  0x98   : > { %935 = vmatprep.subr.bf16.mxu0 %v1270_v0  ;;  %932 = vmatprep.mubr.msk.f32.mxu0 %vm1271_vm0, %v1272_v1  ;;  %v430_v4 = vld [vmem:[%s1546_s11 + $0x10] sm:$0xff]  ;;  %v936_v5 = vpack.c.bf16 %v429_v3, %v428_v2  ;;  %v431_v6 = vld [vmem:[%s1546_s11 + $0x18] sm:$0xff]  ;;  %v432_v8 = vld [vmem:[%s1546_s11 + $0x20] sm:$0xff]  ;;  %p417_p3 = scmp.lt.s32.totalorder %s1400_s21, 2  ;;  %s843_s18 = sshll.u32 %s1400_s21, 7 }
  0x99   : > { %v939_v7 = vpack.c.bf16 %v431_v6, %v430_v4  ;;  %v433_v9 = vld [vmem:[%s1546_s11 + $0x28] sm:$0xff]  ;;  %v542_v10 = vld [vmem:[%s1549_s19 + $0x80] sm:$0xff]  ;;  %v434_v11 = vld [vmem:[%s1546_s11 + $0x30] sm:$0xff]  ;;  %s416_s9 = scalar_lea.vmem [#allocation11], %s836_s10  ;;  %s657_s12 = scalar_lea.sflag [#allocation5], %s1533_s22 }
  0x9a   : > { %937 = vmatpush3.bf16.msra.mxu0 %v936_v5  ;;  %v435_v12 = vld [vmem:[%s1546_s11 + $0x38] sm:$0xff]  ;;  %v543_v13 = vld [vmem:[%s1549_s19 + $0x88] sm:$0xff]  ;;  %v526_v14 = vld [vmem:[%s1549_s19] sm:$0xff]  ;;  %v942_v16 = vpack.c.bf16 %v433_v9, %v432_v8  ;;  %s418_s29 = scalar_select %p417_p3, %s1400_s21, 2 }
  0x9b   : > { %938 = vmatprep.subr.bf16.mxu0 %v1270_v0  ;;  %v527_v15 = vld [vmem:[%s1549_s19 + $0x8] sm:$0xff]  ;;  %v959_v17 = vpack.c.bf16 %v543_v13, %v542_v10  ;;  %v544_v19 = vld [vmem:[%s1549_s19 + $0x90] sm:$0xff]  ;;  %v545_v20 = vld [vmem:[%s1549_s19 + $0x98] sm:$0xff]  ;;  %v945_v27 = vpack.c.bf16 %v435_v12, %v434_v11  ;;  %p1715_p11 = scmp.ne.s32.totalorder %s1704_s15, 0  ;;  %s1274_s21 = smov [#allocation11]  }
  0x9c   : > { %v961_v18 = vpack.c.bf16 %v527_v15, %v526_v14  ;;  %v528_v21 = vld [vmem:[%s1549_s19 + $0x10] sm:$0xff]  ;;  %v963_v22 = vpack.c.bf16 %v545_v20, %v544_v19  ;;  %v529_v23 = vld [vmem:[%s1549_s19 + $0x18] sm:$0xff]  ;;  %v546_v24 = vld [vmem:[%s1549_s19 + $0xa0] sm:$0xff]  ;;  %s419_s16 = scalar_lea.vmem %s1675_s3, %s418_s29  ;;  %s422_s28 = scalar_lea.vmem %s1677_s5, %s418_s29 }
  0x9d   : > { %v547_v25 = vld [vmem:[%s1549_s19 + $0xa8] sm:$0xff]  ;;  %960 = vmatprep.subr.bf16.mxu1 %v959_v17  ;;  %v965_v26 = vpack.c.bf16 %v529_v23, %v528_v21  ;;  %v436_v28 = vld [vmem:[%s1546_s11 + $0x40] sm:$0xff]  ;;  %v548_v33 = vld [vmem:[%s1549_s19 + $0xb0] sm:$0xff]  ;;  %s425_s8 = scalar_lea.vmem %s1678_s6, %s418_s29  ;;  %v639_v17 = vlaneseq  ;;  %s1192_s10 = sshll.u32 %s1274_s21, 4  ;;  %s1193_s10 = int_to_ptr.vmem [resolvable:$false] %s1192_s10 }
  0x9e   : > { %940 = vmatpush3.bf16.msra.mxu0 %v939_v7  ;;  %962 = vmatpush3.bf16.msra.mxu1 %v961_v18  ;;  %v967_v29 = vpack.c.bf16 %v547_v25, %v546_v24  ;;  %v530_v30 = vld [vmem:[%s1549_s19 + $0x20] sm:$0xff]  ;;  %v531_v31 = vld [vmem:[%s1549_s19 + $0x28] sm:$0xff]  ;;  %v549_v34 = vld [vmem:[%s1549_s19 + $0xb8] sm:$0xff]  ;;  %s1194_s29 = scalar_lea.vmem %s1193_s10, 256 }
  0x9f   : > { %941 = vmatprep.subr.bf16.mxu0 %v1270_v0  ;;  %964 = vmatprep.subr.bf16.mxu1 %v963_v22  ;;  %v437_v32 = vld [vmem:[%s1546_s11 + $0x48] sm:$0xff]  ;;  %v969_v35 = vpack.c.bf16 %v531_v31, %v530_v30  ;;  %v438_v37 = vld [vmem:[%s1546_s11 + $0x50] sm:$0xff]  ;;  %v971_v38 = vpack.c.bf16 %v549_v34, %v548_v33  ;;  %v533_v40 = vld [vmem:[%s1549_s19 + $0x38] sm:$0xff]  ;;  %v640_v23 = vshrl.u32 %v639_v17, 7 }
  0xa0   : > { %v948_v36 = vpack.c.bf16 %v437_v32, %v436_v28  ;;  %v532_v39 = vld [vmem:[%s1549_s19 + $0x30] sm:$0xff]  ;;  %v439_v41 = vld [vmem:[%s1546_s11 + $0x58] sm:$0xff]  ;;  %v550_v42 = vld [vmem:[%s1549_s19 + $0xc0] sm:$0xff] }
  0xa1   : > { %v551_v43 = vld [vmem:[%s1549_s19 + $0xc8] sm:$0xff]  ;;  %v973_v44 = vpack.c.bf16 %v533_v40, %v532_v39  ;;  %v951_v45 = vpack.c.bf16 %v439_v41, %v438_v37  ;;  %v440_v46 = vld [vmem:[%s1546_s11 + $0x60] sm:$0xff]  ;;  %v552_v51 = vld [vmem:[%s1549_s19 + $0xd0] sm:$0xff]  ;;  %v641_v25 = vsub.s32 0, %v640_v23 }
  0xa2   : > { %943 = vmatpush3.bf16.msra.mxu0 %v942_v16  ;;  %966 = vmatpush3.bf16.msra.mxu1 %v965_v26  ;;  %v975_v47 = vpack.c.bf16 %v551_v43, %v550_v42  ;;  %v534_v48 = vld [vmem:[%s1549_s19 + $0x40] sm:$0xff]  ;;  %v535_v49 = vld [vmem:[%s1549_s19 + $0x48] sm:$0xff]  ;;  %v553_v52 = vld [vmem:[%s1549_s19 + $0xd8] sm:$0xff]  ;;  %v1273_v26 = vmov 0  }
  0xa3   : > { %944 = vmatprep.subr.bf16.mxu0 %v1270_v0  ;;  %968 = vmatprep.subr.bf16.mxu1 %v967_v29  ;;  %v441_v50 = vld [vmem:[%s1546_s11 + $0x68] sm:$0xff]  ;;  %v977_v53 = vpack.c.bf16 %v535_v49, %v534_v48  ;;  %v442_v55 = vld [vmem:[%s1546_s11 + $0x70] sm:$0xff]  ;;  %v979_v56 = vpack.c.bf16 %v553_v52, %v552_v51  ;;  %v537_v58 = vld [vmem:[%s1549_s19 + $0x58] sm:$0xff] }
  0xa4   : > { %v954_v54 = vpack.c.bf16 %v441_v50, %v440_v46  ;;  %v536_v57 = vld [vmem:[%s1549_s19 + $0x50] sm:$0xff]  ;;  %v443_v59 = vld [vmem:[%s1546_s11 + $0x78] sm:$0xff]  ;;  %v554_v60 = vld [vmem:[%s1549_s19 + $0xe0] sm:$0xff]  ;;  %s1629_s11 = scalar_lea.hbm %s1679_s7, %s843_s18 }
  0xa5   : > { %v555_v61 = vld [vmem:[%s1549_s19 + $0xe8] sm:$0xff]  ;;  %v981_v62 = vpack.c.bf16 %v537_v58, %v536_v57  ;;  %v957_v63 = vpack.c.bf16 %v443_v59, %v442_v55  ;;  %v538_v2 = vld [vmem:[%s1549_s19 + $0x60] sm:$0xff]  ;;  %v556_v6 = vld [vmem:[%s1549_s19 + $0xf0] sm:$0xff] }
  0xa6   : > { %946 = vmatpush3.bf16.msra.mxu0 %v945_v27  ;;  %970 = vmatpush3.bf16.msra.mxu1 %v969_v35  ;;  %v983_v1 = vpack.c.bf16 %v555_v61, %v554_v60  ;;  %v539_v3 = vld [vmem:[%s1549_s19 + $0x68] sm:$0xff]  ;;  %v557_v7 = vld [vmem:[%s1549_s19 + $0xf8] sm:$0xff]  ;;  %v540_v9 = vld [vmem:[%s1549_s19 + $0x70] sm:$0xff] }
  0xa7   : > { %947 = vmatprep.subr.bf16.mxu0 %v1270_v0  ;;  %972 = vmatprep.subr.bf16.mxu1 %v971_v38  ;;  %v985_v4 = vpack.c.bf16 %v539_v3, %v538_v2  ;;  %v426_v5 = vld [vmem:[#allocation3] sm:$0xff]  ;;  %v987_v8 = vpack.c.bf16 %v557_v7, %v556_v6  ;;  %v541_v10 = vld [vmem:[%s1549_s19 + $0x78] sm:$0xff] }
  0xa8   : > { %v989_v11 = vpack.c.bf16 %v541_v10, %v540_v9  ;;  %v427_v16 = vld [vmem:[%s1538_s24] sm:$0xff]  ;;  %v841_v19 = vld [vmem:[%s422_s28] ss:$0 sm:$0xff]  ;;  %s670_s24 = sshll.u32 %s416_s9, 4  ;;  %s1631_s24 = int_to_ptr.vmem [resolvable:$true] %s670_s24 }
  0xa9   : > { %v636_v21 = vld [vmem:[%s425_s8] sm:$0x1]  ;;  %s1188_s19 = scalar_lea.vmem %s1631_s24, 128  ;;  %p1195_p5 = scmp.lt.s32.totalorder %s1631_s24, %s1193_s10 }
  0xaa   : > { %949 = vmatpush3.bf16.msra.mxu0 %v948_v36  ;;  %974 = vmatpush3.bf16.msra.mxu1 %v973_v44  ;;  %vm637_vm1 = vcmp.gt.f32.partialorder %v636_v21, 0.0  ;;  %p1189_p8 = scmp.ne.s32.totalorder %s1631_s24, %s1188_s19  ;;  %p1196_p7 = scmp.lt.s32.totalorder %s1194_s29, %s1188_s19 }
  0xab   : > { %950 = vmatprep.subr.bf16.mxu0 %v1270_v0  ;;  %976 = vmatprep.subr.bf16.mxu1 %v975_v47  ;;  %v638_v27 = vsel %vm637_vm1, 1, %v1273_v26 }
  0xac   : > { %v642_v28 = vrot.slane %v638_v27, %v641_v25  ;;  %p1190_p12 = pnand %p1189_p8, %p1715_p11  ;;  %p1197_p2 = por %p1196_p7, %p1195_p5 }
  0xae   : > { %952 = vmatpush3.bf16.msra.mxu0 %v951_v45  ;;  %978 = vmatpush3.bf16.msra.mxu1 %v977_v53  ;;  %vm643_vm2 = vcmp.eq.s32.totalorder %v642_v28, 1  ;;  %p1191_p6 = pneg %p1190_p12 }
  0xaf   : > { %953 = vmatprep.subr.bf16.mxu0 %v1270_v0  ;;  %980 = vmatprep.subr.bf16.mxu1 %v979_v56 }
  0xb0   : > { %p1198_p10 = pnand %p1197_p2, %p1191_p6 }
  0xb2   : > { %955 = vmatpush3.bf16.msra.mxu0 %v954_v54  ;;  %982 = vmatpush3.bf16.msra.mxu1 %v981_v62 }
  0xb3   : > { %956 = vmatprep.subr.bf16.mxu0 %v1270_v0  ;;  %984 = vmatprep.subr.bf16.mxu1 %v983_v1  ;;  %v840_v0 = vld [vmem:[%s419_s16] ss:$0 sm:$0xff] }
  0xb6   : > { %958 = vmatpush3.bf16.msra.mxu0 %v957_v63  ;;  %986 = vmatpush3.bf16.msra.mxu1 %v985_v4 }
  0xb7   : > { %988 = vmatprep.subr.bf16.mxu1 %v987_v8 }
  0xb9   : > { %933 = vmatmul.mubr.f32.vlgmr.msra.gmra.mrb[0].mxu0 %v426_v5 }
  0xba   : > { %990 = vmatpush3.bf16.msra.mxu1 %v989_v11 }
 0x18c   : > { %v517_v12 = vpop.f32.mrb[0].mxu0 }
 0x18d   : > { %v934_v13 = vpop.f32.mrb[1].mxu0  ;;  %v518_v14 = vadd.f32 %v840_v0, %v517_v12 }
 0x18f   : > { %v521_v15 = vmax.f32 %v518_v14, 0.0 }
 0x191   : > { %629 = vmatprep.mubr.f32.mxu1 %v521_v15 }
 0x192   : > { %630 = vmatmul.mubr.f32.vlgmr.msra.gmra.mrb[0].mxu1 %v427_v16 }
 0x265   : > { %v897_v18 = vpop.f32.mrb[0].mxu1 }
 0x266   : > { %v898_v20 = vpop.f32.mrb[1].mxu1 }
 0x267   : > { %v899_v22 = vadd.f32 %v898_v20, %v897_v18 }
 0x269   : > { %v632_v24 = vadd.f32 %v899_v22, %v841_v19 }
 0x26b   : > { %1064 = vtanh.f32 %v632_v24 }
 0x275   : > { %v1065_v29 = vpop.eup %1064 }
 0x276   : > { %v644_v30 = vsel %vm643_vm2, %v1065_v29, -1e+30 }
 0x277   : > { %645 = vmax.xlane.f32.xlu0 %v644_v30 }
 0x304   : > { %v646_v31 = vpop.xlane.xlu0 %645 }
 0x305   : > { %v647_v32 = vsub.f32 %v644_v30, %v646_v31 }
 0x307   : > { %v648_v33 = vmul.f32 1.442695, %v647_v32 }
 0x309   : > { %1066 = vpow2.f32 %v648_v33 }
 0x313   : > { %v1067_v34 = vpop.eup %1066 }
 0x314   : > { %650 = vadd.xlane.f32.xlu0 %v1067_v34 }
 0x3a1   : > { %v651_v35 = vpop.xlane.xlu0 %650 }
 0x3a2   : > { %1068 = vrcp.f32 %v651_v35 }
 0x3ac   : > { %v1069_v36 = vpop.eup %1068 }
 0x3ad   : > { %v653_v37 = vmul.f32 %v1069_v36, %v1067_v34 }
 0x3af   : > { %v654_v38 = vmul.f32 %v653_v37, %v427_v16 }
 0x3b1   : > { %655 = vst [vmem:[%s416_s9] sm:$0xff] %v654_v38 }
 0x3b2   : > { %1201 = shalt.err (!%p1198_p10)
}
 0x3b3   : > { %s1202_s22 = scalar_lea.hbm %s1629_s11, 128  ;;  %s1206_s16 = scalar_lea.hbm %s1679_s7, 384 }
 0x3b4   : > { %p1203_p1 = scmp.ne.s32.totalorder %s1629_s11, %s1202_s22  ;;  %p1207_p0 = scmp.lt.u32.totalorder %s1629_s11, %s1679_s7 }
 0x3b5   : > { %p1208_p13 = scmp.lt.u32.totalorder %s1206_s16, %s1202_s22  ;;  %p1210_p8 = scmp.lt.u32.totalorder %s1202_s22, %s1629_s11 }
 0x3b6   : > { %p1204_p9 = pnand %p1203_p1, %p1715_p11 }
 0x3b7   : > { %p1209_p3 = por %p1208_p13, %p1207_p0 }
 0x3b8   : > { %p1205_p4 = pneg %p1204_p9 }
 0x3b9   : > { %p1211_p12 = por %p1210_p8, %p1209_p3 }
 0x3bb   : > { %p1212_p6 = pnand %p1211_p12, %p1205_p4 }
 0x3bd   : > { %1215 = shalt.err (!%p1212_p6)
}
 0x3be   : > { %1001 = dma.vmem_to_hbm [thread:$0]  (%p1715_p11), %s1631_s24, 128, %s1629_s11, %s657_s12  }
 0x3bf PF: > { %s1716_s28 = sld [smem:[#allocation16_spill]]  ;;  %s1717_s14 = sld [smem:[#allocation20_spill]] }
 0x3c0   : > { %p1024_p5 = scmp.ge.s32.totalorder %s1262_s27, 2 }
 0x3c5   : > { %s682_s23 = sand.u32 1, %s1716_s28   ;;  %p1718_p7 = scmp.ne.s32.totalorder %s1717_s14, 0 }
 0x3c6   : > { %s683_s8 = scalar_lea.sflag [#allocation5], %s682_s23 }
 0x3c7   : > { %p1018_p2 = pnand %p1024_p5, %p1718_p7 }
 0x3c9   : > { %1245 = dma.done.wait (!%p1018_p2), %s683_s8, 128  }
 0x3ca   : > { %1247 = vsyncadd (!%p1018_p2), %s683_s8, 4294967168  ;;  %s1719_s27 = sld [smem:[#allocation18_spill]]  ;;  %s1720_s18 = sld [smem:[#allocation17_spill]] }
 0x3cb   : > { %s1721_s26 = sld [smem:[#allocation19_spill]]  ;;  %s1722_s24 = smov %s1254_s25 }
 0x3d0   : > { %p24_p10 = scmp.ge.s32.totalorder %s1719_s27, 5   ;;  %s1723_s25 = smov %s1720_s18 }
 0x3d2   :  { %26 = sbr.rel (!%p24_p10) target bundleno = 10 (0xa), region = 131 }
 0x3d9   :  { %688 = vsyncpa [#allocation4], 1 }
 0x3da   :  { %690 = vsyncpa [#allocation4 + $0x1], 1 }
 0x3db   :  { %691 = vsyncpa [#allocation7], 1 }
 0x3dc   :  { %693 = vsyncpa [#allocation7 + $0x1], 1 }
 0x3dd   :  { %694 = vsyncpa [#allocation10], 1 }
 0x3de   :  { %696 = vsyncpa [#allocation10 + $0x1], 1 }
 0x3df   :  { %697 = vsyncpa [#allocation5], 1 }
 0x3e0   :  { %699 = vsyncpa [#allocation5 + $0x1], 1 }

</bundles_post_ra>
